<compile_context>
chip_gen: v6e
topology: v6e:2x2x1
jax: 0.10.0
libtpu: 0.0.40
codegen_flags: <defaults>
</compile_context>

<pallas_src>
import functools

import jax
import jax.numpy as jnp
from jax.experimental import pallas as pl
from jax.experimental.pallas import tpu as pltpu

EPS = 1e-5
_LANES = 128
_VMEM_LIMIT_BYTES = 32 * 1024 * 1024     # scoped VMEM request (fits v7x 64 MiB/core)
_PER_TILE_F32_BYTES = 2 * 1024 * 1024    # budget per live full-tile f32 temp
_MIN_GRID_STEPS = 8                      # keep pipeline + megacore engaged


def _sublane_multiple(dtype):
    """Dtype-native sublane packing: 8 for f32, 16 for bf16, 32 for int8/fp8."""
    itemsize = jnp.dtype(dtype).itemsize
    return max(8, 32 // max(itemsize, 1))


def _pick_row_tile(B, d_pad, io_dtype):
    """Row tile sized by f32 temp footprint, kept small enough for >= ~8 steps."""
    sub = _sublane_multiple(io_dtype)
    if B <= sub:
        return B                          # tiny batch: one full-extent block
    tb_budget = max(_PER_TILE_F32_BYTES // (d_pad * 4), sub)
    tb_steps = pl.cdiv(B, _MIN_GRID_STEPS)  # never collapse to a 1-step grid
    tb = min(tb_budget, max(tb_steps, sub))
    tb = max((tb // sub) * sub, sub)
    return min(tb, B)


def _layernorm_kernel(x_ref, scale_ref, shift_ref, o_ref, *,
                      inv_d, d_true, d_pad, compute_dtype):
    x = x_ref[...]                                           # [TB, Dp], native dtype

    # Mean: f32-accumulating lane reduce straight off the native-dtype tile.
    # Zero padding (lanes >= d_true) contributes nothing to the sum.
    s1 = jnp.sum(x, axis=-1, keepdims=True, dtype=jnp.float32)
    mean = s1 * inv_d                                        # [TB, 1] f32

    centered = x.astype(compute_dtype) - mean.astype(compute_dtype)

    # Two-pass variance (numerically safe, never negative), f32 accumulation.
    c32 = centered.astype(jnp.float32)
    if d_pad != d_true:
        lane = jax.lax.broadcasted_iota(jnp.int32, c32.shape, dimension=1)
        c32 = jnp.where(lane < d_true, c32, 0.0)             # mask padded lanes
    var = jnp.sum(c32 * c32, axis=-1, keepdims=True) * inv_d
    rstd = jax.lax.rsqrt(var + EPS)                          # [TB, 1] f32

    out = centered * rstd.astype(compute_dtype) * scale_ref[...] + shift_ref[...]
    o_ref[...] = out.astype(o_ref.dtype)


def layer_norm(x, scale, shift, *, row_tile=None, compute_dtype=jnp.float32):
    """LayerNorm over the last dim. x: [B, D]; scale, shift: [D]."""
    B, D = x.shape
    d_pad = D if D % _LANES == 0 else pl.cdiv(D, _LANES) * _LANES

    # Cast the tiny affine params once in the wrapper; pad everything to a
    # lane-dense width so the kernel's loads/stores are unmasked.
    scale2d = scale.reshape(1, D).astype(compute_dtype)
    shift2d = shift.reshape(1, D).astype(compute_dtype)
    if d_pad != D:
        x_p = jnp.pad(x, ((0, 0), (0, d_pad - D)))
        scale2d = jnp.pad(scale2d, ((0, 0), (0, d_pad - D)))
        shift2d = jnp.pad(shift2d, ((0, 0), (0, d_pad - D)))
    else:
        x_p = x

    tb = row_tile if row_tile is not None else _pick_row_tile(B, d_pad, x.dtype)
    grid = (pl.cdiv(B, tb),)

    kernel = functools.partial(
        _layernorm_kernel,
        inv_d=1.0 / D, d_true=D, d_pad=d_pad, compute_dtype=compute_dtype)

    out = pl.pallas_call(
        kernel,
        out_shape=jax.ShapeDtypeStruct((B, d_pad), x.dtype),
        grid_spec=pltpu.PrefetchScalarGridSpec(
            num_scalar_prefetch=0,
            grid=grid,
            in_specs=[
                pl.BlockSpec((tb, d_pad), lambda i: (i, 0)),   # x: row-tiled
                pl.BlockSpec((1, d_pad), lambda i: (0, 0)),    # scale: resident
                pl.BlockSpec((1, d_pad), lambda i: (0, 0)),    # shift: resident
            ],
            out_specs=pl.BlockSpec((tb, d_pad), lambda i: (i, 0)),
        ),
        compiler_params=pltpu.CompilerParams(
            dimension_semantics=("parallel",),                 # rows independent
            vmem_limit_bytes=_VMEM_LIMIT_BYTES,
        ),
    )(x_p, scale2d, shift2d)

    return out[:, :D] if d_pad != D else out


def _reference(x, scale, shift):
    mean = jnp.mean(x, axis=-1, keepdims=True)
    var = jnp.mean((x - mean) ** 2, axis=-1, keepdims=True)
    return scale * (x - mean) / jnp.sqrt(var + EPS) + shift


if __name__ == "__main__":
    key = jax.random.PRNGKey(0)

    # Shapes consistent with the module: batch=2, emb_dim=5.
    batch, emb_dim = 2, 5
    x = jax.random.normal(key, (batch, emb_dim), dtype=jnp.float32)
    scale = jnp.ones((emb_dim,), dtype=jnp.float32)   # nn.Parameter(torch.ones)
    shift = jnp.zeros((emb_dim,), dtype=jnp.float32)  # nn.Parameter(torch.zeros)

    out = jax.block_until_ready(layer_norm(x, scale, shift))
    ref = _reference(x, scale, shift)
    assert jnp.allclose(out, ref, atol=1e-5, rtol=1e-5), "mismatch vs reference"

    # Multi-block + ragged last block + padded-D path.
    x2 = jax.random.normal(jax.random.PRNGKey(1), (20, emb_dim), dtype=jnp.float32)
    out2 = jax.block_until_ready(layer_norm(x2, scale, shift, row_tile=8))
    ref2 = _reference(x2, scale, shift)
    assert jnp.allclose(out2, ref2, atol=1e-5, rtol=1e-5), "mismatch (tiled path)"

    # Lane-dense (D % 128 == 0) multi-step path.
    d3 = 256
    x3 = jax.random.normal(jax.random.PRNGKey(2), (32, d3), dtype=jnp.float32)
    s3 = jax.random.normal(jax.random.PRNGKey(3), (d3,), dtype=jnp.float32)
    b3 = jax.random.normal(jax.random.PRNGKey(4), (d3,), dtype=jnp.float32)
    out3 = jax.block_until_ready(layer_norm(x3, s3, b3))
    ref3 = _reference(x3, s3, b3)
    assert jnp.allclose(out3, ref3, atol=1e-4, rtol=1e-4), "mismatch (dense-D path)"

    print("KERNEL_OK")
</pallas_src>

<mosaic_0001>
module attributes {stable_mosaic.version = 11 : i64} {
  func.func @_layernorm_kernel(%arg0: i32, %arg1: memref<2x128xf32, #tpu.memory_space<vmem>>, %arg2: memref<1x128xf32, #tpu.memory_space<vmem>>, %arg3: memref<1x128xf32, #tpu.memory_space<vmem>>, %arg4: memref<2x128xf32, #tpu.memory_space<vmem>>) attributes {dimension_semantics = [#tpu.dimension_semantics<parallel>], iteration_bounds = array<i64: 1>, scalar_prefetch = 0 : i64, scratch_operands = 0 : i64, tpu.core_type = #tpu.core_type<tc>, window_params = [{transform_indices = @transform_0, window_bounds = array<i64: 2, 128>}, {pipeline_mode = #tpu.pipeline_mode<synchronous>, transform_indices = @transform_1, window_bounds = array<i64: 1, 128>}, {pipeline_mode = #tpu.pipeline_mode<synchronous>, transform_indices = @transform_2, window_bounds = array<i64: 1, 128>}, {transform_indices = @transform_3, window_bounds = array<i64: 2, 128>}]} {
    %c0 = arith.constant 0 : index
    %c0_0 = arith.constant 0 : index
    %0 = vector.load %arg1[%c0, %c0_0] : memref<2x128xf32, #tpu.memory_space<vmem>>, vector<2x128xf32>
    %cst = arith.constant dense<0.000000e+00> : vector<2xf32>
    %1 = vector.multi_reduction <add>, %0, %cst [1] : vector<2x128xf32> to vector<2xf32>
    %2 = vector.shape_cast %1 : vector<2xf32> to vector<2x1xf32>
    %cst_1 = arith.constant 2.000000e-01 : f32
    %3 = vector.broadcast %cst_1 : f32 to vector<2x1xf32>
    %4 = arith.mulf %2, %3 : vector<2x1xf32>
    %5 = vector.broadcast %4 : vector<2x1xf32> to vector<2x128xf32>
    %6 = arith.subf %0, %5 : vector<2x128xf32>
    %7 = tpu.iota {dimensions = array<i32: 1>} : vector<2x128xi32>
    %c5_i32 = arith.constant 5 : i32
    %8 = vector.broadcast %c5_i32 : i32 to vector<2x128xi32>
    %9 = arith.cmpi slt, %7, %8 : vector<2x128xi32>
    %cst_2 = arith.constant 0.000000e+00 : f32
    %10 = vector.broadcast %cst_2 : f32 to vector<2x128xf32>
    %11 = arith.select %9, %6, %10 : vector<2x128xi1>, vector<2x128xf32>
    %12 = arith.mulf %11, %11 : vector<2x128xf32>
    %cst_3 = arith.constant dense<0.000000e+00> : vector<2xf32>
    %13 = vector.multi_reduction <add>, %12, %cst_3 [1] : vector<2x128xf32> to vector<2xf32>
    %14 = vector.shape_cast %13 : vector<2xf32> to vector<2x1xf32>
    %cst_4 = arith.constant 2.000000e-01 : f32
    %15 = vector.broadcast %cst_4 : f32 to vector<2x1xf32>
    %16 = arith.mulf %14, %15 : vector<2x1xf32>
    %cst_5 = arith.constant 9.99999974E-6 : f32
    %17 = vector.broadcast %cst_5 : f32 to vector<2x1xf32>
    %18 = arith.addf %16, %17 : vector<2x1xf32>
    %19 = math.rsqrt %18 : vector<2x1xf32>
    %20 = vector.broadcast %19 : vector<2x1xf32> to vector<2x128xf32>
    %21 = arith.mulf %6, %20 : vector<2x128xf32>
    %c0_6 = arith.constant 0 : index
    %c0_7 = arith.constant 0 : index
    %22 = vector.load %arg2[%c0_6, %c0_7] : memref<1x128xf32, #tpu.memory_space<vmem>>, vector<1x128xf32>
    %23 = vector.broadcast %22 : vector<1x128xf32> to vector<2x128xf32>
    %24 = arith.mulf %21, %23 : vector<2x128xf32>
    %c0_8 = arith.constant 0 : index
    %c0_9 = arith.constant 0 : index
    %25 = vector.load %arg3[%c0_8, %c0_9] : memref<1x128xf32, #tpu.memory_space<vmem>>, vector<1x128xf32>
    %26 = vector.broadcast %25 : vector<1x128xf32> to vector<2x128xf32>
    %27 = arith.addf %24, %26 : vector<2x128xf32>
    %c0_10 = arith.constant 0 : index
    %c0_11 = arith.constant 0 : index
    %28 = vector.load %arg4[%c0_10, %c0_11] : memref<2x128xf32, #tpu.memory_space<vmem>>, vector<2x128xf32>
    tpu.vector_store %arg4[%c0_10, %c0_11], %27 {strides = array<i32>} : memref<2x128xf32, #tpu.memory_space<vmem>>, vector<2x128xf32>,
    return
  }
  func.func @transform_0(%arg0: i32) -> (i32, i32) {
    %c0_i32 = arith.constant 0 : i32
    %c0_i32_0 = arith.constant 0 : i32
    return %arg0, %c0_i32 : i32, i32
  }
  func.func @transform_1(%arg0: i32) -> (i32, i32) {
    %c0_i32 = arith.constant 0 : i32
    %c0_i32_0 = arith.constant 0 : i32
    %c0_i32_1 = arith.constant 0 : i32
    return %c0_i32, %c0_i32_0 : i32, i32
  }
  func.func @transform_2(%arg0: i32) -> (i32, i32) {
    %c0_i32 = arith.constant 0 : i32
    %c0_i32_0 = arith.constant 0 : i32
    %c0_i32_1 = arith.constant 0 : i32
    return %c0_i32, %c0_i32_0 : i32, i32
  }
  func.func @transform_3(%arg0: i32) -> (i32, i32) {
    %c0_i32 = arith.constant 0 : i32
    %c0_i32_0 = arith.constant 0 : i32
    return %arg0, %c0_i32 : i32, i32
  }
}

</mosaic_0001>

<bundles_post_ra>
// kernel: tpu_custom_call.1
= control target key start
LH: loop header
LB: loop body
LE: loop exit
PB: predicated region body
PF: predicated region fallthrough
CT: control target
= control target key end

     0   :  { %8 = vsyncpa [#allocation3], 0  ;;  %s162_s0 = inlined_call_operand.hbm [shape: f32[2,128], index: 0, kind: input, shape index: {}]   ;;  %s163_s1 = inlined_call_operand.vmem [shape: f32[1,128], index: 1, kind: input, shape index: {}]   ;;  %s164_s2 = inlined_call_operand.vmem [shape: f32[1,128], index: 2, kind: input, shape index: {}]   ;;  %s165_s3 = inlined_call_operand.hbm [shape: f32[2,128], index: 3, kind: output, shape index: {}]  }
   0x1   :  { %9 = vsyncpa [#allocation4], 0  ;;  %s128_s12 = smov [#allocation2]  }
   0x2   :  { %s16_s13 = sshll.u32 %s128_s12, 4  ;;  %s17_s13 = int_to_ptr.vmem [resolvable:$true] %s16_s13 }
   0x3   :  { %s92_s14 = scalar_lea.vmem %s17_s13, 32  ;;  %p97_p1 = scmp.lt.s32.totalorder %s17_s13, %s17_s13 }
   0x4   :  { %p93_p0 = scmp.ne.s32.totalorder %s17_s13, %s92_s14  ;;  %p98_p2 = scmp.lt.s32.totalorder %s92_s14, %s92_s14 }
   0x6   :  { %p99_p3 = por %p98_p2, %p97_p1 }
   0x8   :  { %p100_p4 = pnand %p99_p3, %p93_p0 }
   0xa   :  { %103 = shalt.err (!%p100_p4)
}
   0xb   :  { %19 = dma.hbm_to_vmem [thread:$0]  %s162_s0, 32, %s17_s13, [#allocation3]  }
   0xc   :  { %124 = dma.done.wait [#allocation3], 32  }
   0xd   :  { %125 = vsyncadd [#allocation3], 4294967264  ;;  %vm28_vm0 = vcmask 1041408   ;;  %v27_v0 = vld [vmem:[#allocation2] sm:$0x3]  ;;  %v34_v2 = vlaneseq  ;;  %s129_s20 = smov [#allocation5]  }
   0xe   :  { %v29_v1 = vsel %vm28_vm0, %v27_v0, 0.0  ;;  %v78_v14 = vld [vmem:[%s163_s1] ss:$0 sm:$0xff]  ;;  %s69_s21 = sshll.u32 %s129_s20, 4  ;;  %s70_s21 = int_to_ptr.vmem [resolvable:$true] %s69_s21 }
   0xf   :  { %30 = vadd.xlane.f32.xlu0 %v29_v1  ;;  %v35_v3 = vand.u32 127, %v34_v2  ;;  %v79_v16 = vld [vmem:[%s164_s2] ss:$0 sm:$0xff]  ;;  %s104_s22 = scalar_lea.vmem %s70_s21, 32  ;;  %p109_p6 = scmp.lt.s32.totalorder %s70_s21, %s70_s21 }
  0x10   :  { %p105_p5 = scmp.ne.s32.totalorder %s70_s21, %s104_s22  ;;  %p110_p7 = scmp.lt.s32.totalorder %s104_s22, %s104_s22 }
  0x11   :  { %vm36_vm1 = vcmp.lt.s32.totalorder %v35_v3, 5 }
  0x12   :  { %p111_p8 = por %p110_p7, %p109_p6 }
  0x14   :  { %p112_p9 = pnand %p111_p8, %p105_p5 }
  0x98   :  { %v31_v4 = vpop.xlane.xlu0 %30 }
  0x99   :  { %v32_v5 = vmul.f32 0.2, %v31_v4 }
  0x9b   :  { %v33_v6 = vsub.f32 %v27_v0, %v32_v5 }
  0x9d   :  { %v37_v7 = vsel %vm36_vm1, %v33_v6, 0.0 }
  0x9e   :  { %v38_v8 = vmul.f32 %v37_v7, %v37_v7 }
  0xa0   :  { %v39_v9 = vsel %vm28_vm0, %v38_v8, 0.0 }
  0xa1   :  { %40 = vadd.xlane.f32.xlu0 %v39_v9 }
 0x12a   :  { %v41_v10 = vpop.xlane.xlu0 %40 }
 0x12b   :  { %v42_v11 = vmul.f32 0.2, %v41_v10 }
 0x12d   :  { %v43_v12 = vadd.f32 1e-05, %v42_v11 }
 0x12f   :  { %82 = vrsqrt.f32 %v43_v12 }
 0x13c   :  { %v83_v13 = vpop.eup %82 }
 0x13d   :  { %v45_v15 = vmul.f32 %v83_v13, %v33_v6 }
 0x13f   :  { %v53_v17 = vmul.f32 %v78_v14, %v45_v15 }
 0x141   :  { %v61_v18 = vadd.f32 %v79_v16, %v53_v17 }
 0x143   :  { %62 = vst [vmem:[#allocation5] sm:$0x3] %v61_v18 }
 0x144   :  { %115 = shalt.err (!%p112_p9)
}
 0x145   :  { %72 = dma.vmem_to_hbm [thread:$0]  %s70_s21, 32, %s165_s3, [#allocation4]  }
 0x146   :  { %126 = dma.done.wait [#allocation4], 32  }
 0x147   :  { %127 = vsyncadd [#allocation4], 4294967264 }
 0x148   :  { %76 = vsyncpa [#allocation3], 1 }
 0x149   :  { %77 = vsyncpa [#allocation4], 1 }

</bundles_post_ra>
